<compile_context>
chip_gen: v5e
topology: v5e:2x2
jax: 0.10.0
libtpu: 0.0.40
codegen_flags: <defaults>
</compile_context>

<pallas_src>
import functools

import numpy as np
import jax
import jax.numpy as jnp
from jax import lax
from jax.experimental import pallas as pl
from jax.experimental.pallas import tpu as pltpu

_TN = 128  # lane-tile width of the packed batch dimension


# ----------------------- plain-JAX glue: build the unitary U -----------------------
# TODO(synk): queryQ()'s unitary construction (chain of 2x2 krons + 4x4 matmuls) is
# left in plain JAX; it is tiny scalar-ish work with no good Pallas mapping.

def _rx(phi):
    c = jnp.cos(phi / 2).astype(jnp.complex64)
    s = jnp.sin(phi / 2).astype(jnp.complex64)
    return jnp.stack([c, -1j * s, -1j * s, c]).reshape(2, 2)


def _ry(phi):
    c = jnp.cos(phi / 2).astype(jnp.complex64)
    s = jnp.sin(phi / 2).astype(jnp.complex64)
    return jnp.stack([c, -s, s, c]).reshape(2, 2)


def _rz(phi):
    phi_c = phi.astype(jnp.complex64)
    z = jnp.zeros((), jnp.complex64)
    return jnp.stack([jnp.exp(-1j * phi_c / 2), z, z, jnp.exp(1j * phi_c / 2)]).reshape(2, 2)


def _multi_kron(mats):
    out = jnp.ones((1, 1), jnp.complex64)
    for m in mats:
        out = jnp.kron(out, m)
    return out


def _gate_expand_1toN(U, N, target):
    eye = jnp.eye(2, dtype=jnp.complex64)
    return _multi_kron([eye] * target + [U] + [eye] * (N - target - 1))


def _gate_sequence_product(U_list, n_qubits):
    U_overall = jnp.eye(2 ** n_qubits, dtype=jnp.complex64)
    for U in U_list:          # left_to_right=True
        U_overall = U @ U_overall
    return U_overall


def query_unitary(weight, w_mul, n_qubits):
    """Equivalent of init_cir_q.queryQ() — returns the 2^n x 2^n complex unitary."""
    w = weight * w_mul
    cir = []
    for q in range(n_qubits):
        cir.append(_gate_expand_1toN(_rx(w[q * 3 + 0]), n_qubits, q))
        cir.append(_gate_expand_1toN(_ry(w[q * 3 + 1]), n_qubits, q))
        cir.append(_gate_expand_1toN(_rz(w[q * 3 + 2]), n_qubits, q))
    return _gate_sequence_product(cir, n_qubits)


# ----------------------------- Pallas kernel: U @ x @ U^H --------------------------

def _qattn_kernel(u_ref, w_ref, x_ref, z_ref):
    # u_ref : (3, M_pad, 128)  [Ur, Ui, Ur+Ui]          (grid-resident)
    # w_ref : (3, 128, 128)    [Wr, Wi, Wr+Wi], W = kron(I, dag(U))   (grid-resident)
    # x_ref : (3, 128, TN)     [Xr, Xi, Xr+Xi] batch-packed lane tile
    # z_ref : (2, M_pad, TN)   output planes for this lane tile (lane-dense stores)
    dot = lambda a, b: lax.dot_general(                       # A @ B on the MXU
        a, b, (((1,), (0,)), ((), ())), preferred_element_type=jnp.float32)

    # ---- Y = U @ X_packed  (complex product via Gauss 3-mult; sums precomputed) ----
    t1 = dot(u_ref[0], x_ref[0])          # Ur @ Xr
    t2 = dot(u_ref[1], x_ref[1])          # Ui @ Xi
    t3 = dot(u_ref[2], x_ref[2])          # (Ur+Ui) @ (Xr+Xi)
    yr = t1 - t2
    yi = t3 - t1 - t2

    # ---- Z = Y @ W,  W = kron(I, dag(U))  (Gauss 3-mult; Wr+Wi precomputed) ----
    s1 = dot(yr, w_ref[0])                # Yr @ Wr
    s2 = dot(yi, w_ref[1])                # Yi @ Wi
    s3 = dot(yr + yi, w_ref[2])           # (Yr+Yi) @ (Wr+Wi)
    z_ref[0] = s1 - s2
    z_ref[1] = s3 - s1 - s2


def quantum_query_attention(U, x):
    """Computes U @ x_b @ dag(U) for a (batch of) operand(s) with one Pallas call.

    U: (D, D) complex.  x: (D, D) or (B, D, D) complex.  Requires D <= 128 and
    D | 128 (always true for D = 2^n_qubits, n_qubits <= 7).
    """
    squeeze = x.ndim == 2
    if squeeze:
        x = x[None]
    B, D, _ = x.shape
    assert D <= _TN and _TN % D == 0, "single-tile design needs D | 128"

    m_pad = max(8, ((D + 7) // 8) * 8)          # sublane-padded row count
    n = B * D                                   # packed lane width (valid part)
    n_tiles = (n + _TN - 1) // _TN
    n_pad = n_tiles * _TN

    # --- host-side (jitted) packing: done once per call, amortized over the batch ---
    ur = U.real.astype(jnp.float32)
    ui = U.imag.astype(jnp.float32)
    u_planes = jnp.zeros((3, m_pad, _TN), jnp.float32)
    u_planes = u_planes.at[0, :D, :D].set(ur)
    u_planes = u_planes.at[1, :D, :D].set(ui)
    u_planes = u_planes.at[2, :D, :D].set(ur + ui)

    # Block-diagonal right operand: one 128x128 tile of kron(I, dag(U)), identical
    # for every lane tile (batch blocks never straddle a 128 boundary since D | 128).
    w = jnp.kron(jnp.eye(_TN // D, dtype=U.dtype), jnp.conj(U).T)
    wr = w.real.astype(jnp.float32)
    wi = w.imag.astype(jnp.float32)
    w_planes = jnp.stack([wr, wi, wr + wi])

    # X_packed[:, b*D:(b+1)*D] = x_b ; rows padded to 128 (contraction dim).
    xp = jnp.transpose(x, (1, 0, 2)).reshape(D, n)
    xr = xp.real.astype(jnp.float32)
    xi = xp.imag.astype(jnp.float32)
    x_planes = jnp.zeros((3, _TN, n_pad), jnp.float32)
    x_planes = x_planes.at[0, :D, :n].set(xr)
    x_planes = x_planes.at[1, :D, :n].set(xi)
    x_planes = x_planes.at[2, :D, :n].set(xr + xi)

    z = pl.pallas_call(
        _qattn_kernel,
        grid=(n_tiles,),
        in_specs=[
            pl.BlockSpec((3, m_pad, _TN), lambda j: (0, 0, 0)),   # U planes: resident
            pl.BlockSpec((3, _TN, _TN), lambda j: (0, 0, 0)),     # W planes: resident
            pl.BlockSpec((3, _TN, _TN), lambda j: (0, 0, j)),     # X lane tile
        ],
        out_specs=pl.BlockSpec((2, m_pad, _TN), lambda j: (0, 0, j)),
        out_shape=jax.ShapeDtypeStruct((2, m_pad, n_pad), jnp.float32),
        compiler_params=pltpu.CompilerParams(
            dimension_semantics=("parallel",)),
    )(u_planes, w_planes, x_planes)

    # Lane-dense kernel output -> slice / unpack / recombine in plain jitted JAX.
    zr = z[0, :D, :n].reshape(D, B, D).transpose(1, 0, 2)
    zi = z[1, :D, :n].reshape(D, B, D).transpose(1, 0, 2)
    out = (zr + 1j * zi).astype(jnp.complex64)
    return out[0] if squeeze else out


@functools.partial(jax.jit, static_argnames=("n_qubits",))
def init_cir_q_forward(weight, w_mul, x, *, n_qubits):
    """Full forward pass of init_cir_q: build U, then U @ x @ dag(U) via Pallas."""
    U = query_unitary(weight, w_mul, n_qubits)
    return quantum_query_attention(U, x)


# --------------------------------------- main --------------------------------------

if __name__ == "__main__":
    n_qubits = 2
    D = 2 ** n_qubits                  # 4
    B = 4                              # batch of operands handled by one kernel call

    # Deterministic parameter init mirroring init_cir_q.__init__
    gain, lrmul, use_wscale = 2 ** 0.5, 1.0, True
    he_std = gain * 5 ** (-0.5)
    init_std = 1.0 / lrmul if use_wscale else he_std / lrmul
    w_mul = he_std * lrmul if use_wscale else lrmul

    key = jax.random.PRNGKey(0)
    kw, kxr, kxi = jax.random.split(key, 3)
    weight = jax.random.uniform(kw, (n_qubits * 3,), minval=0.0, maxval=2 * np.pi,
                                dtype=jnp.float32) * init_std

    # Inputs: complex (2^n x 2^n) matrices (the operand of forward()), batched.
    x = (jax.random.normal(kxr, (B, D, D), dtype=jnp.float32)
         + 1j * jax.random.normal(kxi, (B, D, D), dtype=jnp.float32)).astype(jnp.complex64)

    out = jax.block_until_ready(init_cir_q_forward(weight, w_mul, x, n_qubits=n_qubits))

    # Pure-JAX reference.
    U = query_unitary(weight, w_mul, n_qubits)
    ref = jnp.einsum('ij,bjk,lk->bil', U, x, jnp.conj(U))
    np.testing.assert_allclose(np.asarray(out), np.asarray(ref), atol=1e-5, rtol=1e-5)

    # Unbatched (module-style) path through the same kernel.
    out1 = jax.block_until_ready(init_cir_q_forward(weight, w_mul, x[0], n_qubits=n_qubits))
    ref1 = U @ x[0] @ jnp.conj(U).T
    np.testing.assert_allclose(np.asarray(out1), np.asarray(ref1), atol=1e-5, rtol=1e-5)

    print("KERNEL_OK")
</pallas_src>

<mosaic_0001>
module attributes {stable_mosaic.version = 11 : i64} {
  func.func @_qattn_kernel(%arg0: i32, %arg1: memref<3x8x128xf32, #tpu.memory_space<vmem>>, %arg2: memref<3x128x128xf32, #tpu.memory_space<vmem>>, %arg3: memref<3x128x128xf32, #tpu.memory_space<vmem>>, %arg4: memref<2x8x128xf32, #tpu.memory_space<vmem>>) attributes {dimension_semantics = [#tpu.dimension_semantics<parallel>], iteration_bounds = array<i64: 1>, scalar_prefetch = 0 : i64, scratch_operands = 0 : i64, tpu.core_type = #tpu.core_type<tc>, window_params = [{pipeline_mode = #tpu.pipeline_mode<synchronous>, transform_indices = @transform_0, window_bounds = array<i64: 3, 8, 128>}, {pipeline_mode = #tpu.pipeline_mode<synchronous>, transform_indices = @transform_1, window_bounds = array<i64: 3, 128, 128>}, {transform_indices = @transform_2, window_bounds = array<i64: 3, 128, 128>}, {transform_indices = @transform_3, window_bounds = array<i64: 2, 8, 128>}]} {
    %c0 = arith.constant 0 : index
    %c0_0 = arith.constant 0 : index
    %c0_1 = arith.constant 0 : index
    %0 = vector.load %arg1[%c0, %c0_0, %c0_1] : memref<3x8x128xf32, #tpu.memory_space<vmem>>, vector<1x8x128xf32>
    %1 = vector.shape_cast %0 : vector<1x8x128xf32> to vector<8x128xf32>
    %c0_2 = arith.constant 0 : index
    %c0_3 = arith.constant 0 : index
    %c0_4 = arith.constant 0 : index
    %2 = vector.load %arg3[%c0_2, %c0_3, %c0_4] : memref<3x128x128xf32, #tpu.memory_space<vmem>>, vector<1x128x128xf32>
    %3 = vector.shape_cast %2 : vector<1x128x128xf32> to vector<128x128xf32>
    %cst = arith.constant dense<0.000000e+00> : vector<8x128xf32>
    %4 = tpu.matmul %1, %3, %cst {dimension_numbers = #tpu.dot_dimension_numbers<[1], [0], [0], [1], [0, 0, 1, 1], [], []>} : vector<8x128xf32>, vector<128x128xf32>, vector<8x128xf32> -> vector<8x128xf32>
    %c1 = arith.constant 1 : index
    %c0_5 = arith.constant 0 : index
    %c0_6 = arith.constant 0 : index
    %5 = vector.load %arg1[%c1, %c0_5, %c0_6] : memref<3x8x128xf32, #tpu.memory_space<vmem>>, vector<1x8x128xf32>
    %6 = vector.shape_cast %5 : vector<1x8x128xf32> to vector<8x128xf32>
    %c1_7 = arith.constant 1 : index
    %c0_8 = arith.constant 0 : index
    %c0_9 = arith.constant 0 : index
    %7 = vector.load %arg3[%c1_7, %c0_8, %c0_9] : memref<3x128x128xf32, #tpu.memory_space<vmem>>, vector<1x128x128xf32>
    %8 = vector.shape_cast %7 : vector<1x128x128xf32> to vector<128x128xf32>
    %cst_10 = arith.constant dense<0.000000e+00> : vector<8x128xf32>
    %9 = tpu.matmul %6, %8, %cst_10 {dimension_numbers = #tpu.dot_dimension_numbers<[1], [0], [0], [1], [0, 0, 1, 1], [], []>} : vector<8x128xf32>, vector<128x128xf32>, vector<8x128xf32> -> vector<8x128xf32>
    %c2 = arith.constant 2 : index
    %c0_11 = arith.constant 0 : index
    %c0_12 = arith.constant 0 : index
    %10 = vector.load %arg1[%c2, %c0_11, %c0_12] : memref<3x8x128xf32, #tpu.memory_space<vmem>>, vector<1x8x128xf32>
    %11 = vector.shape_cast %10 : vector<1x8x128xf32> to vector<8x128xf32>
    %c2_13 = arith.constant 2 : index
    %c0_14 = arith.constant 0 : index
    %c0_15 = arith.constant 0 : index
    %12 = vector.load %arg3[%c2_13, %c0_14, %c0_15] : memref<3x128x128xf32, #tpu.memory_space<vmem>>, vector<1x128x128xf32>
    %13 = vector.shape_cast %12 : vector<1x128x128xf32> to vector<128x128xf32>
    %cst_16 = arith.constant dense<0.000000e+00> : vector<8x128xf32>
    %14 = tpu.matmul %11, %13, %cst_16 {dimension_numbers = #tpu.dot_dimension_numbers<[1], [0], [0], [1], [0, 0, 1, 1], [], []>} : vector<8x128xf32>, vector<128x128xf32>, vector<8x128xf32> -> vector<8x128xf32>
    %15 = arith.subf %4, %9 : vector<8x128xf32>
    %16 = arith.subf %14, %4 : vector<8x128xf32>
    %17 = arith.subf %16, %9 : vector<8x128xf32>
    %c0_17 = arith.constant 0 : index
    %c0_18 = arith.constant 0 : index
    %c0_19 = arith.constant 0 : index
    %18 = vector.load %arg2[%c0_17, %c0_18, %c0_19] : memref<3x128x128xf32, #tpu.memory_space<vmem>>, vector<1x128x128xf32>
    %19 = vector.shape_cast %18 : vector<1x128x128xf32> to vector<128x128xf32>
    %cst_20 = arith.constant dense<0.000000e+00> : vector<8x128xf32>
    %20 = tpu.matmul %15, %19, %cst_20 {dimension_numbers = #tpu.dot_dimension_numbers<[1], [0], [0], [1], [0, 0, 1, 1], [], []>} : vector<8x128xf32>, vector<128x128xf32>, vector<8x128xf32> -> vector<8x128xf32>
    %c1_21 = arith.constant 1 : index
    %c0_22 = arith.constant 0 : index
    %c0_23 = arith.constant 0 : index
    %21 = vector.load %arg2[%c1_21, %c0_22, %c0_23] : memref<3x128x128xf32, #tpu.memory_space<vmem>>, vector<1x128x128xf32>
    %22 = vector.shape_cast %21 : vector<1x128x128xf32> to vector<128x128xf32>
    %cst_24 = arith.constant dense<0.000000e+00> : vector<8x128xf32>
    %23 = tpu.matmul %17, %22, %cst_24 {dimension_numbers = #tpu.dot_dimension_numbers<[1], [0], [0], [1], [0, 0, 1, 1], [], []>} : vector<8x128xf32>, vector<128x128xf32>, vector<8x128xf32> -> vector<8x128xf32>
    %24 = arith.addf %15, %17 : vector<8x128xf32>
    %c2_25 = arith.constant 2 : index
    %c0_26 = arith.constant 0 : index
    %c0_27 = arith.constant 0 : index
    %25 = vector.load %arg2[%c2_25, %c0_26, %c0_27] : memref<3x128x128xf32, #tpu.memory_space<vmem>>, vector<1x128x128xf32>
    %26 = vector.shape_cast %25 : vector<1x128x128xf32> to vector<128x128xf32>
    %cst_28 = arith.constant dense<0.000000e+00> : vector<8x128xf32>
    %27 = tpu.matmul %24, %26, %cst_28 {dimension_numbers = #tpu.dot_dimension_numbers<[1], [0], [0], [1], [0, 0, 1, 1], [], []>} : vector<8x128xf32>, vector<128x128xf32>, vector<8x128xf32> -> vector<8x128xf32>
    %28 = arith.subf %20, %23 : vector<8x128xf32>
    %c0_29 = arith.constant 0 : index
    %c0_30 = arith.constant 0 : index
    %c0_31 = arith.constant 0 : index
    %29 = vector.load %arg4[%c0_29, %c0_30, %c0_31] : memref<2x8x128xf32, #tpu.memory_space<vmem>>, vector<1x8x128xf32>
    %30 = vector.shape_cast %29 : vector<1x8x128xf32> to vector<8x128xf32>
    %31 = vector.shape_cast %28 : vector<8x128xf32> to vector<1x8x128xf32>
    tpu.vector_store %arg4[%c0_29, %c0_30, %c0_31], %31 {strides = array<i32>} : memref<2x8x128xf32, #tpu.memory_space<vmem>>, vector<1x8x128xf32>,
    %32 = arith.subf %27, %20 : vector<8x128xf32>
    %33 = arith.subf %32, %23 : vector<8x128xf32>
    %c1_32 = arith.constant 1 : index
    %c0_33 = arith.constant 0 : index
    %c0_34 = arith.constant 0 : index
    %34 = vector.load %arg4[%c1_32, %c0_33, %c0_34] : memref<2x8x128xf32, #tpu.memory_space<vmem>>, vector<1x8x128xf32>
    %35 = vector.shape_cast %34 : vector<1x8x128xf32> to vector<8x128xf32>
    %36 = vector.shape_cast %33 : vector<8x128xf32> to vector<1x8x128xf32>
    tpu.vector_store %arg4[%c1_32, %c0_33, %c0_34], %36 {strides = array<i32>} : memref<2x8x128xf32, #tpu.memory_space<vmem>>, vector<1x8x128xf32>,
    return
  }
  func.func @transform_0(%arg0: i32) -> (i32, i32, i32) {
    %c0_i32 = arith.constant 0 : i32
    %c0_i32_0 = arith.constant 0 : i32
    %c0_i32_1 = arith.constant 0 : i32
    %c0_i32_2 = arith.constant 0 : i32
    return %c0_i32, %c0_i32_0, %c0_i32_1 : i32, i32, i32
  }
  func.func @transform_1(%arg0: i32) -> (i32, i32, i32) {
    %c0_i32 = arith.constant 0 : i32
    %c0_i32_0 = arith.constant 0 : i32
    %c0_i32_1 = arith.constant 0 : i32
    %c0_i32_2 = arith.constant 0 : i32
    return %c0_i32, %c0_i32_0, %c0_i32_1 : i32, i32, i32
  }
  func.func @transform_2(%arg0: i32) -> (i32, i32, i32) {
    %c0_i32 = arith.constant 0 : i32
    %c0_i32_0 = arith.constant 0 : i32
    %c0_i32_1 = arith.constant 0 : i32
    return %c0_i32, %c0_i32_0, %arg0 : i32, i32, i32
  }
  func.func @transform_3(%arg0: i32) -> (i32, i32, i32) {
    %c0_i32 = arith.constant 0 : i32
    %c0_i32_0 = arith.constant 0 : i32
    %c0_i32_1 = arith.constant 0 : i32
    return %c0_i32, %c0_i32_0, %arg0 : i32, i32, i32
  }
}

</mosaic_0001>

<bundles_post_ra>
// kernel: custom-call
= control target key start
LH: loop header
LB: loop body
LE: loop exit
PB: predicated region body
PF: predicated region fallthrough
CT: control target
= control target key end

     0   :  { %2 = vsyncpa [#allocation0], 0  ;;  %s55_s0 = inlined_call_operand.hbm [shape: c64[4,4,4], index: 0, kind: input, shape index: {}]   ;;  %s56_s1 = inlined_call_operand.vmem [shape: f32[4,4,4], index: 1, kind: output, shape index: {}]  }
   0x1   :  { %s4_s8 = sshll.u32 %s55_s0, 4  ;;  %s6_s11 = sshll.u32 %s56_s1, 4  ;;  %s5_s8 = int_to_ptr.hbm [resolvable:$true] %s4_s8  ;;  %s7_s11 = int_to_ptr.vmem [resolvable:$true] %s6_s11 }
   0x2   :  { %9 = dma.hbm_to_vmem [thread:$0]  %s5_s8, 256, %s7_s11, [#allocation0] }
   0x3   :  { %37 = dma.done.wait [#allocation0], 256  }
   0x4   :  { %38 = vsyncadd [#allocation0], 4294967040 }
   0x5   :  { %12 = vsyncpa [#allocation0], 1 }

// kernel: custom-call.1
= control target key start
LH: loop header
LB: loop body
LE: loop exit
PB: predicated region body
PF: predicated region fallthrough
CT: control target
= control target key end

     0   :  { %s56_s0 = inlined_call_operand.hbm [shape: c64[4,4,4], index: 0, kind: input, shape index: {}]   ;;  %s57_s1 = inlined_call_operand.vmem [shape: f32[4,4,4], index: 1, kind: output, shape index: {}]  }
   0x1   :  { %s2_s8 = scalar_lea.hbm %s56_s0, 16 }
   0x2   :  { %3 = vsyncpa [#allocation0], 0  ;;  %s5_s9 = sshll.u32 %s2_s8, 4  ;;  %s7_s12 = sshll.u32 %s57_s1, 4  ;;  %s6_s9 = int_to_ptr.hbm [resolvable:$true] %s5_s9  ;;  %s8_s12 = int_to_ptr.vmem [resolvable:$true] %s7_s12 }
   0x3   :  { %10 = dma.hbm_to_vmem [thread:$0]  %s6_s9, 256, %s8_s12, [#allocation0] }
   0x4   :  { %38 = dma.done.wait [#allocation0], 256  }
   0x5   :  { %39 = vsyncadd [#allocation0], 4294967040 }
   0x6   :  { %13 = vsyncpa [#allocation0], 1 }

// kernel: squeeze.14
= control target key start
LH: loop header
LB: loop body
LE: loop exit
PB: predicated region body
PF: predicated region fallthrough
CT: control target
= control target key end

     0   :  { %s58_s8 = smov 116   ;;  %s59_s9 = smov 120   ;;  %vm7_vm0 = vcmask 31744   ;;  %s85_s0 = inlined_call_operand.vmem [shape: f32[1,4,16], index: 0, kind: input, shape index: {}]   ;;  %s86_s1 = inlined_call_operand.vmem [shape: f32[4,4,4], index: 1, kind: output, shape index: {}]  }
   0x1   :  { %v4_v0 = vld [vmem:[%s85_s0] sm:$0xf]  ;;  %s57_s0 = smov 124  }
   0x2   :  { %5 = vst [vmem:[#allocation1] sm:$0xf] %v4_v0 }
   0x9   :  { %v9_v1 = vld [vmem:[#allocation1] sm:$0xf]  }
   0xa   :  { %v21_v2 = vld [vmem:[#allocation1] sm:$0xf]   ;;  %10 = vrot.lane.b32.xlu0 %v9_v1, %s57_s0 }
   0xb   :  { %22 = vrot.lane.b32.xlu1 %v21_v2, %s58_s8  ;;  %v15_v3 = vld [vmem:[#allocation1] sm:$0xf]  }
   0xc   :  { %v6_v4 = vld [vmem:[#allocation1] sm:$0xf]  }
   0xd   :  { %8 = vst.msk [vmem:[#allocation0] ss:$8 sm:$0xf] %vm7_vm0, %v6_v4  }
  0x12   :  { %16 = vrot.lane.b32.xlu0 %v15_v3, %s59_s9 }
  0x7c   :  { %v11_v5 = vpop.permute.xlu0 %10  }
  0x7d   :  { %v23_v6 = vpop.permute.xlu1 %22   ;;  %14 = vst.msk [vmem:[#allocation0 + $0x1] ss:$8 sm:$0xf] %vm7_vm0, %v11_v5  }
  0x7e   :  { %26 = vst.msk [vmem:[#allocation0 + $0x3] ss:$8 sm:$0xf] %vm7_vm0, %v23_v6  }
  0x84   :  { %v17_v7 = vpop.permute.xlu0 %16  }
  0x85   :  { %20 = vst.msk [vmem:[#allocation0 + $0x2] ss:$8 sm:$0xf] %vm7_vm0, %v17_v7  }
  0x8c   :  { %v29_v8 = vld [vmem:[#allocation0] sm:$0xf]  ;;  %v34_v9 = vld [vmem:[#allocation0 + $0x8] sm:$0xf]  ;;  %v40_v10 = vld [vmem:[#allocation0 + $0x10] sm:$0xf] }
  0x8d   :  { %32 = vst [vmem:[%s86_s1] sm:$0xf] %v29_v8  ;;  %v46_v11 = vld [vmem:[#allocation0 + $0x18] sm:$0xf] }
  0x8e   :  { %51 = vst [vmem:[%s86_s1 + $0x4] sm:$0xf] %v34_v9 }
  0x8f   :  { %52 = vst [vmem:[%s86_s1 + $0x8] sm:$0xf] %v40_v10 }
  0x90   :  { %53 = vst [vmem:[%s86_s1 + $0xc] sm:$0xf] %v46_v11 }

// kernel: custom-call.2
= control target key start
LH: loop header
LB: loop body
LE: loop exit
PB: predicated region body
PF: predicated region fallthrough
CT: control target
= control target key end

     0   :  { %s61_s0 = inlined_call_operand.vmem [shape: f32[4,4,4], index: 0, kind: input, shape index: {}]   ;;  %s62_s1 = inlined_call_operand.vmem [shape: f32[4,4,4], index: 1, kind: input, shape index: {}]   ;;  %s63_s2 = inlined_call_operand.vmem [shape: c64[4,4,4], index: 2, kind: output, shape index: {}]  }
   0x1   :  { %v4_v0 = vld [vmem:[%s61_s0] sm:$0xff]  ;;  %v17_v1 = vld [vmem:[%s61_s0 + $0x8] sm:$0xff] }
   0x2   :  { %v10_v2 = vld [vmem:[%s62_s1] sm:$0xff]  ;;  %5 = vst [vmem:[%s63_s2] sm:$0xff] %v4_v0  ;;  %v20_v3 = vld [vmem:[%s62_s1 + $0x8] sm:$0xff] }
   0x3   :  { %18 = vst [vmem:[%s63_s2 + $0x8] sm:$0xff] %v17_v1 }
   0x4   :  { %19 = vst [vmem:[%s63_s2 + $0x10] sm:$0xff] %v10_v2 }
   0x5   :  { %21 = vst [vmem:[%s63_s2 + $0x18] sm:$0xff] %v20_v3 }

// kernel: init_cir_q_forward.1
= control target key start
LH: loop header
LB: loop body
LE: loop exit
PB: predicated region body
PF: predicated region fallthrough
CT: control target
= control target key end

     0   :  { %s643_s2 = inlined_call_operand.vmem [shape: f32[3,128,128], index: 2, kind: input, shape index: {}]   ;;  %s644_s1 = inlined_call_operand.vmem [shape: f32[3,128,128], index: 1, kind: input, shape index: {}]   ;;  %s645_s0 = inlined_call_operand.vmem [shape: f32[3,8,128], index: 0, kind: input, shape index: {}]   ;;  %s646_s3 = inlined_call_operand.vmem [shape: f32[2,8,128], index: 3, kind: output, shape index: {}]  }
   0x1   :  { %v286_v0 = vld [vmem:[%s643_s2 + $0x178] sm:$0xff]  ;;  %v285_v3 = vld [vmem:[%s643_s2 + $0x170] sm:$0xff]  ;;  %v284_v6 = vld [vmem:[%s643_s2 + $0x168] sm:$0xff] }
   0x2   :  { %v30_v1 = vld [vmem:[%s643_s2 + $0x78] sm:$0xff]  ;;  %109 = vmatpush.msra.mxu2 %v286_v0  ;;  %v29_v4 = vld [vmem:[%s643_s2 + $0x70] sm:$0xff]  ;;  %v28_v7 = vld [vmem:[%s643_s2 + $0x68] sm:$0xff] }
   0x3   :  { %v269_v2 = vld [vmem:[%s643_s2 + $0xf8] sm:$0xff]  ;;  %31 = vmatpush.msra.mxu0 %v30_v1  ;;  %v268_v5 = vld [vmem:[%s643_s2 + $0xf0] sm:$0xff]  ;;  %v267_v8 = vld [vmem:[%s643_s2 + $0xe8] sm:$0xff] }
   0x4   :  { %70 = vmatpush.msra.mxu1 %v269_v2  ;;  %110 = vmatpush.msra.mxu2 %v285_v3  ;;  %v283_v9 = vld [vmem:[%s643_s2 + $0x160] sm:$0xff]  ;;  %v282_v12 = vld [vmem:[%s643_s2 + $0x158] sm:$0xff]  ;;  %v281_v15 = vld [vmem:[%s643_s2 + $0x150] sm:$0xff] }
   0x5   :  { %32 = vmatpush.msra.mxu0 %v29_v4  ;;  %v27_v10 = vld [vmem:[%s643_s2 + $0x60] sm:$0xff]  ;;  %v26_v13 = vld [vmem:[%s643_s2 + $0x58] sm:$0xff]  ;;  %v25_v16 = vld [vmem:[%s643_s2 + $0x50] sm:$0xff] }
   0x6   :  { %71 = vmatpush.msra.mxu1 %v268_v5  ;;  %111 = vmatpush.msra.mxu2 %v284_v6  ;;  %v266_v11 = vld [vmem:[%s643_s2 + $0xe0] sm:$0xff]  ;;  %v265_v14 = vld [vmem:[%s643_s2 + $0xd8] sm:$0xff]  ;;  %v264_v17 = vld [vmem:[%s643_s2 + $0xd0] sm:$0xff] }
   0x7   :  { %33 = vmatpush.msra.mxu0 %v28_v7  ;;  %v280_v18 = vld [vmem:[%s643_s2 + $0x148] sm:$0xff]  ;;  %v279_v21 = vld [vmem:[%s643_s2 + $0x140] sm:$0xff]  ;;  %v278_v24 = vld [vmem:[%s643_s2 + $0x138] sm:$0xff] }
   0x8   :  { %72 = vmatpush.msra.mxu1 %v267_v8  ;;  %112 = vmatpush.msra.mxu2 %v283_v9  ;;  %v24_v19 = vld [vmem:[%s643_s2 + $0x48] sm:$0xff]  ;;  %v23_v22 = vld [vmem:[%s643_s2 + $0x40] sm:$0xff]  ;;  %v22_v25 = vld [vmem:[%s643_s2 + $0x38] sm:$0xff] }
   0x9   :  { %34 = vmatpush.msra.mxu0 %v27_v10  ;;  %v263_v20 = vld [vmem:[%s643_s2 + $0xc8] sm:$0xff]  ;;  %v262_v23 = vld [vmem:[%s643_s2 + $0xc0] sm:$0xff]  ;;  %v261_v26 = vld [vmem:[%s643_s2 + $0xb8] sm:$0xff] }
   0xa   :  { %73 = vmatpush.msra.mxu1 %v266_v11  ;;  %113 = vmatpush.msra.mxu2 %v282_v12  ;;  %v277_v27 = vld [vmem:[%s643_s2 + $0x130] sm:$0xff]  ;;  %v147_v30 = vld [vmem:[%s644_s1 + $0x78] sm:$0xff]  ;;  %v276_v32 = vld [vmem:[%s643_s2 + $0x128] sm:$0xff] }
   0xb   :  { %35 = vmatpush.msra.mxu0 %v26_v13  ;;  %v21_v28 = vld [vmem:[%s643_s2 + $0x30] sm:$0xff]  ;;  %v20_v33 = vld [vmem:[%s643_s2 + $0x28] sm:$0xff]  ;;  %148 = vmatpush.msra.mxu3 %v147_v30  ;;  %v275_v36 = vld [vmem:[%s643_s2 + $0x120] sm:$0xff] }
   0xc   :  { %74 = vmatpush.msra.mxu1 %v265_v14  ;;  %114 = vmatpush.msra.mxu2 %v281_v15  ;;  %v260_v29 = vld [vmem:[%s643_s2 + $0xb0] sm:$0xff]  ;;  %v259_v34 = vld [vmem:[%s643_s2 + $0xa8] sm:$0xff]  ;;  %v19_v37 = vld [vmem:[%s643_s2 + $0x20] sm:$0xff] }
   0xd   :  { %36 = vmatpush.msra.mxu0 %v25_v16  ;;  %v146_v31 = vld [vmem:[%s644_s1 + $0x70] sm:$0xff]  ;;  %v145_v35 = vld [vmem:[%s644_s1 + $0x68] sm:$0xff]  ;;  %v258_v38 = vld [vmem:[%s643_s2 + $0xa0] sm:$0xff] }
   0xe   :  { %75 = vmatpush.msra.mxu1 %v264_v17  ;;  %115 = vmatpush.msra.mxu2 %v280_v18  ;;  %v144_v39 = vld [vmem:[%s644_s1 + $0x60] sm:$0xff]  ;;  %v274_v40 = vld [vmem:[%s643_s2 + $0x118] sm:$0xff]  ;;  %v273_v44 = vld [vmem:[%s643_s2 + $0x110] sm:$0xff] }
   0xf   :  { %37 = vmatpush.msra.mxu0 %v24_v19  ;;  %149 = vmatpush.msra.mxu3 %v146_v31  ;;  %v18_v41 = vld [vmem:[%s643_s2 + $0x18] sm:$0xff]  ;;  %v17_v45 = vld [vmem:[%s643_s2 + $0x10] sm:$0xff]  ;;  %v272_v48 = vld [vmem:[%s643_s2 + $0x108] sm:$0xff] }
  0x10   :  { %76 = vmatpush.msra.mxu1 %v263_v20  ;;  %116 = vmatpush.msra.mxu2 %v279_v21  ;;  %v257_v42 = vld [vmem:[%s643_s2 + $0x98] sm:$0xff]  ;;  %v256_v46 = vld [vmem:[%s643_s2 + $0x90] sm:$0xff]  ;;  %v16_v49 = vld [vmem:[%s643_s2 + $0x8] sm:$0xff] }
  0x11   :  { %38 = vmatpush.msra.mxu0 %v23_v22  ;;  %150 = vmatpush.msra.mxu3 %v145_v35  ;;  %v143_v43 = vld [vmem:[%s644_s1 + $0x58] sm:$0xff]  ;;  %v142_v47 = vld [vmem:[%s644_s1 + $0x50] sm:$0xff]  ;;  %v255_v50 = vld [vmem:[%s643_s2 + $0x88] sm:$0xff] }
  0x12   :  { %77 = vmatpush.msra.mxu1 %v262_v23  ;;  %117 = vmatpush.msra.mxu2 %v278_v24  ;;  %v141_v51 = vld [vmem:[%s644_s1 + $0x48] sm:$0xff]  ;;  %v271_v52 = vld [vmem:[%s643_s2 + $0x100] sm:$0xff]  ;;  %v270_v54 = vld [vmem:[%s645_s0 + $0x10] sm:$0xff] }
  0x13   :  { %39 = vmatpush.msra.mxu0 %v22_v25  ;;  %151 = vmatpush.msra.mxu3 %v144_v39  ;;  %v15_v53 = vld [vmem:[%s643_s2] sm:$0xff]  ;;  %v253_v57 = vld [vmem:[%s645_s0 + $0x8] sm:$0xff]  ;;  %v302_v58 = vld [vmem:[%s644_s1 + $0xf8] sm:$0xff] }
  0x14   :  { %78 = vmatpush.msra.mxu1 %v261_v26  ;;  %118 = vmatpush.msra.mxu2 %v277_v27  ;;  %v254_v55 = vld [vmem:[%s643_s2 + $0x80] sm:$0xff]  ;;  %v318_v59 = vld [vmem:[%s644_s1 + $0x178] sm:$0xff]  ;;  %v301_v61 = vld [vmem:[%s644_s1 + $0xf0] sm:$0xff] }
  0x15   :  { %40 = vmatpush.msra.mxu0 %v21_v28  ;;  %152 = vmatpush.msra.mxu3 %v143_v43  ;;  %v14_v56 = vld [vmem:[%s645_s0] sm:$0xff]  ;;  %v317_v62 = vld [vmem:[%s644_s1 + $0x170] sm:$0xff]  ;;  %v139_v63 = vld [vmem:[%s644_s1 + $0x38] sm:$0xff] }
  0x16   :  { %79 = vmatpush.msra.mxu1 %v260_v29  ;;  %119 = vmatpush.msra.mxu2 %v276_v32  ;;  %v140_v60 = vld [vmem:[%s644_s1 + $0x40] sm:$0xff]  ;;  %v300_v0 = vld [vmem:[%s644_s1 + $0xe8] sm:$0xff]  ;;  %v138_v2 = vld [vmem:[%s644_s1 + $0x30] sm:$0xff] }
  0x17   :  { %41 = vmatpush.msra.mxu0 %v20_v33  ;;  %153 = vmatpush.msra.mxu3 %v142_v47  ;;  %v316_v1 = vld [vmem:[%s644_s1 + $0x168] sm:$0xff]  ;;  %v299_v3 = vld [vmem:[%s644_s1 + $0xe0] sm:$0xff]  ;;  %v298_v6 = vld [vmem:[%s644_s1 + $0xd8] sm:$0xff] }
  0x18   :  { %80 = vmatpush.msra.mxu1 %v259_v34  ;;  %120 = vmatpush.msra.mxu2 %v275_v36  ;;  %v315_v4 = vld [vmem:[%s644_s1 + $0x160] sm:$0xff]  ;;  %v137_v5 = vld [vmem:[%s644_s1 + $0x28] sm:$0xff]  ;;  %v314_v7 = vld [vmem:[%s644_s1 + $0x158] sm:$0xff] }
  0x19   :  { %42 = vmatpush.msra.mxu0 %v19_v37  ;;  %154 = vmatpush.msra.mxu3 %v141_v51  ;;  %v136_v8 = vld [vmem:[%s644_s1 + $0x20] sm:$0xff]  ;;  %v297_v9 = vld [vmem:[%s644_s1 + $0xd0] sm:$0xff]  ;;  %v135_v11 = vld [vmem:[%s644_s1 + $0x18] sm:$0xff] }
  0x1a   :  { %81 = vmatpush.msra.mxu1 %v258_v38  ;;  %121 = vmatpush.msra.mxu2 %v274_v40  ;;  %v313_v10 = vld [vmem:[%s644_s1 + $0x150] sm:$0xff]  ;;  %v296_v12 = vld [vmem:[%s644_s1 + $0xc8] sm:$0xff]  ;;  %v295_v15 = vld [vmem:[%s644_s1 + $0xc0] sm:$0xff] }
  0x1b   :  { %43 = vmatpush.msra.mxu0 %v18_v41  ;;  %155 = vmatpush.msra.mxu3 %v140_v60  ;;  %v312_v13 = vld [vmem:[%s644_s1 + $0x148] sm:$0xff]  ;;  %v134_v14 = vld [vmem:[%s644_s1 + $0x10] sm:$0xff]  ;;  %v311_v16 = vld [vmem:[%s644_s1 + $0x140] sm:$0xff] }
  0x1c   :  { %82 = vmatpush.msra.mxu1 %v257_v42  ;;  %122 = vmatpush.msra.mxu2 %v273_v44  ;;  %v294_v17 = vld [vmem:[%s644_s1 + $0xb8] sm:$0xff]  ;;  %v293_v19 = vld [vmem:[%s644_s1 + $0xb0] sm:$0xff]  ;;  %v292_v21 = vld [vmem:[%s644_s1 + $0xa8] sm:$0xff] }
  0x1d   :  { %44 = vmatpush.msra.mxu0 %v17_v45  ;;  %156 = vmatpush.msra.mxu3 %v139_v63  ;;  %v310_v18 = vld [vmem:[%s644_s1 + $0x138] sm:$0xff]  ;;  %v309_v20 = vld [vmem:[%s644_s1 + $0x130] sm:$0xff]  ;;  %v133_v22 = vld [vmem:[%s644_s1 + $0x8] sm:$0xff] }
  0x1e   :  { %83 = vmatpush.msra.mxu1 %v256_v46  ;;  %123 = vmatpush.msra.mxu2 %v272_v48  ;;  %v291_v23 = vld [vmem:[%s644_s1 + $0xa0] sm:$0xff]  ;;  %v308_v24 = vld [vmem:[%s644_s1 + $0x128] sm:$0xff]  ;;  %v290_v26 = vld [vmem:[%s644_s1 + $0x98] sm:$0xff] }
  0x1f   :  { %45 = vmatpush.msra.mxu0 %v16_v49  ;;  %157 = vmatpush.msra.mxu3 %v138_v2  ;;  %v132_v25 = vld [vmem:[%s644_s1] sm:$0xff]  ;;  %v289_v28 = vld [vmem:[%s644_s1 + $0x90] sm:$0xff]  ;;  %v306_v29 = vld [vmem:[%s644_s1 + $0x118] sm:$0xff] }
  0x20   :  { %84 = vmatpush.msra.mxu1 %v255_v50  ;;  %124 = vmatpush.msra.mxu2 %v271_v52  ;;  %v307_v27 = vld [vmem:[%s644_s1 + $0x120] sm:$0xff]  ;;  %v288_v30 = vld [vmem:[%s644_s1 + $0x88] sm:$0xff]  ;;  %v305_v31 = vld [vmem:[%s644_s1 + $0x110] sm:$0xff] }
  0x21   :  { %46 = vmatpush.msra.mxu0 %v15_v53  ;;  %125 = vmatmul.f32.vlgmr.msra.gmra.mxu2 %v270_v54  ;;  %v287_v32 = vld [vmem:[%s644_s1 + $0x80] sm:$0xff]  ;;  %v304_v33 = vld [vmem:[%s644_s1 + $0x108] sm:$0xff] }
  0x22   :  { %85 = vmatpush.msra.mxu1 %v254_v55  ;;  %47 = vmatmul.f32.vlgmr.msra.gmra.mxu0 %v14_v56  ;;  %v303_v34 = vld [vmem:[%s644_s1 + $0x100] sm:$0xff] }
  0x23   :  { %86 = vmatmul.f32.vlgmr.msra.gmra.mxu1 %v253_v57  ;;  %185 = vmatpush.msrb.mxu0 %v302_v58 }
  0x24   :  { %223 = vmatpush.msrb.mxu1 %v318_v59  ;;  %158 = vmatpush.msra.mxu3 %v137_v5 }
  0x25   :  { %186 = vmatpush.msrb.mxu0 %v301_v61 }
  0x26   :  { %224 = vmatpush.msrb.mxu1 %v317_v62  ;;  %159 = vmatpush.msra.mxu3 %v136_v8 }
  0x27   :  { %187 = vmatpush.msrb.mxu0 %v300_v0 }
  0x28   :  { %225 = vmatpush.msrb.mxu1 %v316_v1  ;;  %160 = vmatpush.msra.mxu3 %v135_v11 }
  0x29   :  { %188 = vmatpush.msrb.mxu0 %v299_v3 }
  0x2a   :  { %226 = vmatpush.msrb.mxu1 %v315_v4  ;;  %161 = vmatpush.msra.mxu3 %v134_v14 }
  0x2b   :  { %189 = vmatpush.msrb.mxu0 %v298_v6 }
  0x2c   :  { %227 = vmatpush.msrb.mxu1 %v314_v7  ;;  %162 = vmatpush.msra.mxu3 %v133_v22 }
  0x2d   :  { %190 = vmatpush.msrb.mxu0 %v297_v9 }
  0x2e   :  { %228 = vmatpush.msrb.mxu1 %v313_v10  ;;  %163 = vmatpush.msra.mxu3 %v132_v25 }
  0x2f   :  { %191 = vmatpush.msrb.mxu0 %v296_v12 }
  0x30   :  { %229 = vmatpush.msrb.mxu1 %v312_v13 }
  0x31   :  { %192 = vmatpush.msrb.mxu0 %v295_v15 }
  0x32   :  { %230 = vmatpush.msrb.mxu1 %v311_v16 }
  0x33   :  { %193 = vmatpush.msrb.mxu0 %v294_v17 }
  0x34   :  { %231 = vmatpush.msrb.mxu1 %v310_v18 }
  0x35   :  { %194 = vmatpush.msrb.mxu0 %v293_v19 }
  0x36   :  { %232 = vmatpush.msrb.mxu1 %v309_v20 }
  0x37   :  { %195 = vmatpush.msrb.mxu0 %v292_v21 }
  0x38   :  { %233 = vmatpush.msrb.mxu1 %v308_v24 }
  0x39   :  { %196 = vmatpush.msrb.mxu0 %v291_v23 }
  0x3a   :  { %234 = vmatpush.msrb.mxu1 %v307_v27 }
  0x3b   :  { %197 = vmatpush.msrb.mxu0 %v290_v26 }
  0x3c   :  { %235 = vmatpush.msrb.mxu1 %v306_v29 }
  0x3d   :  { %198 = vmatpush.msrb.mxu0 %v289_v28 }
  0x3e   :  { %236 = vmatpush.msrb.mxu1 %v305_v31 }
  0x3f   :  { %199 = vmatpush.msrb.mxu0 %v288_v30 }
  0x40   :  { %237 = vmatpush.msrb.mxu1 %v304_v33 }
  0x41   :  { %200 = vmatpush.msrb.mxu0 %v287_v32 }
  0x42   :  { %238 = vmatpush.msrb.mxu1 %v303_v34 }
  0x9f   :  { %v48_v35 = vpop.f32.mrf.mxu0 }
  0xa0   :  { %v87_v36 = vpop.f32.mrf.mxu1 }
  0xa1   :  { %v129_v37 = vsub.f32 %v48_v35, %v87_v36 }
  0xa3   :  { %164 = vmatmul.f32.vlgmr.msra.gmra.mxu3 %v129_v37 }
  0xa4   :  { %v126_v38 = vpop.f32.mrf.mxu2 }
  0xa5   :  { %v130_v39 = vsub.f32 %v126_v38, %v48_v35 }
  0xa7   :  { %v131_v40 = vsub.f32 %v130_v39, %v87_v36 }
  0xa9   :  { %201 = vmatmul.f32.vlgmr.msrb.gmra.mxu0 %v131_v40  ;;  %v205_v41 = vadd.f32 %v131_v40, %v129_v37 }
  0xab   :  { %239 = vmatmul.f32.vlgmr.msrb.gmra.mxu1 %v205_v41 }
 0x126   :  { %v165_v42 = vpop.f32.mrf.mxu3  ;;  %v202_v43 = vpop.f32.mrf.mxu0 }
 0x127   :  { %v243_v44 = vsub.f32 %v165_v42, %v202_v43 }
 0x128   :  { %v240_v45 = vpop.f32.mrf.mxu1 }
 0x129   :  { %244 = vst [vmem:[%s646_s3] sm:$0xff] %v243_v44  ;;  %v245_v46 = vsub.f32 %v240_v45, %v165_v42 }
 0x12b   :  { %v246_v47 = vsub.f32 %v245_v46, %v202_v43 }
 0x12d   :  { %319 = vst [vmem:[%s646_s3 + $0x8] sm:$0xff] %v246_v47 }

</bundles_post_ra>
